<compile_context>
chip_gen: v6e
topology: v6e:2x2x1
jax: 0.10.0
libtpu: 0.0.40
codegen_flags: <defaults>
</compile_context>

<pallas_src>
import functools

import jax
import jax.numpy as jnp
from jax import lax
from jax.experimental import pallas as pl
from jax.experimental.pallas import tpu as pltpu


def _pair(v):
    return (v, v) if isinstance(v, int) else tuple(v)


def _round_up(x, m):
    return -(-x // m) * m


def _conv_bn_kernel(x_ref, w_ref, s_ref, b_ref, o_ref, *, taps, stride, toh, OW):
    # x_ref: (1, Hp, Wf, Keff)   bf16  whole (kw-folded) padded sample, VMEM resident
    # w_ref: (n_taps, Keff, tn)  bf16  per-tap weight matrices, grid-invariant
    # s_ref: (1, tn)             f32   folded BN scale
    # b_ref: (1, tn)             f32   folded BN bias
    # o_ref: (1, toh, OW, tn)    bf16
    keff = x_ref.shape[-1]
    tn = o_ref.shape[-1]
    i = pl.program_id(2)                    # output-row tile index within sample
    row0 = i * (toh * stride)
    if (toh * stride) % 8 == 0:
        row0 = pl.multiple_of(row0, 8)      # aligned vector loads for the patches

    acc = None
    for t, (dr, dc) in enumerate(taps):
        r = row0 + dr
        if stride == 1:
            patch = x_ref[:, pl.ds(r, toh), pl.ds(dc, OW), :]
        else:
            patch = x_ref[:, pl.ds(r, toh, stride=stride),
                          pl.ds(dc, OW, stride=stride), :]
        p2 = patch.reshape(toh * OW, keff)
        contrib = jnp.dot(p2, w_ref[t], preferred_element_type=jnp.float32)
        acc = contrib if acc is None else acc + contrib   # MRB-friendly on v7x

    y = acc * s_ref[...] + b_ref[...]       # fp32 BN epilogue
    o_ref[...] = y.reshape(1, toh, OW, tn).astype(o_ref.dtype)


def basic_conv2d(x_nchw, weight_oihw, gamma, beta, running_mean, running_var,
                 *, stride=1, padding=0, dilation=1, eps=1e-5,
                 tn=None, target_rows=512, out_layout="NCHW",
                 out_dtype=jnp.bfloat16):
    """Conv2d(bias=False) + BatchNorm2d (eval) fused in a Pallas TPU kernel."""
    N, Cin, H, W = x_nchw.shape
    Cout, _, KH, KW = weight_oihw.shape
    sh, sw = _pair(stride)
    ph, pw = _pair(padding)
    dh, dw = _pair(dilation)
    # TODO(synk): non-square stride/dilation not handled by the in-kernel slicing.
    assert sh == sw and dh == dw, "non-square stride/dilation unsupported"
    s, d = sh, dh

    OH = (H + 2 * ph - d * (KH - 1) - 1) // s + 1
    OW = (W + 2 * pw - d * (KW - 1) - 1) // s + 1

    # --- Cout tiling (lane-dense stores; 256-wide MXU on v6e/v7x) ---
    if tn is None:
        tn = 256 if _round_up(Cout, 128) >= 256 else 128
        # TODO(synk): v5e's 4x128^2 MXU slightly prefers tn=128 even for large Cout.
    Cout_pad = _round_up(Cout, tn)
    n_co = Cout_pad // tn

    # --- OH tiling: prefer a divisor of OH (no garbage tail rows) ---
    rows_cap = max(1, min(OH, target_rows // max(OW, 1)))
    div = next((t for t in range(rows_cap, 0, -1) if OH % t == 0), 1)
    toh = div if div * 2 >= rows_cap else rows_cap
    n_oh = -(-OH // toh)
    if N * n_co * n_oh < 2 and OH >= 2:     # keep both TCs busy on v7x megacore
        toh = -(-OH // 2)
        n_oh = -(-OH // toh)
    OH_pad = n_oh * toh

    # --- input: NCHW -> NHWC bf16, spatial zero-pad (+ rows for OH padding) ---
    Hp_needed = (OH_pad - 1) * s + (KH - 1) * d + 1
    extra_h = max(0, Hp_needed - (H + 2 * ph))
    x_nhwc = jnp.transpose(x_nchw, (0, 2, 3, 1)).astype(jnp.bfloat16)
    x_p = jnp.pad(x_nhwc, ((0, 0), (ph, ph + extra_h), (pw, pw), (0, 0)))
    Hp, Wp = x_p.shape[1], x_p.shape[2]

    # --- small-Cin fix: fold kw taps into the contraction axis (K = KW*Cin) ---
    fold_kw = KW > 1 and (KW * Cin) <= 128
    if fold_kw:
        Wf = Wp - (KW - 1) * d
        x_eff = jnp.concatenate(
            [x_p[:, :, kw * d: kw * d + Wf, :] for kw in range(KW)], axis=-1)
        Keff = KW * Cin
        taps = tuple((kh * d, 0) for kh in range(KH))
        w_r = jnp.transpose(weight_oihw, (2, 3, 1, 0)).reshape(KH, KW * Cin, Cout)
    else:
        x_eff, Wf, Keff = x_p, Wp, Cin
        taps = tuple((kh * d, kw * d) for kh in range(KH) for kw in range(KW))
        w_r = jnp.transpose(weight_oihw, (2, 3, 1, 0)).reshape(KH * KW, Cin, Cout)
    w_r = jnp.pad(w_r, ((0, 0), (0, 0), (0, Cout_pad - Cout))).astype(jnp.bfloat16)

    # --- fold BN (eval) into per-output-channel scale/bias, fp32 ---
    scale = (gamma / jnp.sqrt(running_var + eps)).astype(jnp.float32)
    bias = (beta - running_mean * scale).astype(jnp.float32)
    scale2d = jnp.pad(scale, (0, Cout_pad - Cout)).reshape(1, Cout_pad)
    bias2d = jnp.pad(bias, (0, Cout_pad - Cout)).reshape(1, Cout_pad)

    # --- VMEM budget: double-buffered blocks + fp32 accumulator temps ---
    in_blk = Hp * _round_up(Wf, 16) * _round_up(Keff, 128) * 2
    w_blk = len(taps) * _round_up(Keff, 16) * tn * 2
    sb_blk = 2 * 8 * tn * 4
    out_blk = toh * _round_up(OW, 16) * tn * 2
    acc_tmp = toh * _round_up(OW, 8) * tn * 4
    est = 2 * (in_blk + w_blk + sb_blk + out_blk) + 3 * acc_tmp
    vmem_limit = int(min(max(2 * est, 32 << 20), 127 << 20))

    kernel = functools.partial(_conv_bn_kernel, taps=taps, stride=s,
                               toh=toh, OW=OW)

    out = pl.pallas_call(
        kernel,
        out_shape=jax.ShapeDtypeStruct((N, OH_pad, OW, Cout_pad), out_dtype),
        grid_spec=pltpu.PrefetchScalarGridSpec(
            num_scalar_prefetch=0,
            # Weights / scale / bias are constant across the innermost axis, so
            # they are fetched once per (n, j) instead of every grid step.
            grid=(N, n_co, n_oh),
            in_specs=[
                pl.BlockSpec((1, Hp, Wf, Keff), lambda n, j, i: (n, 0, 0, 0)),
                pl.BlockSpec((len(taps), Keff, tn), lambda n, j, i: (0, 0, j)),
                pl.BlockSpec((1, tn), lambda n, j, i: (0, j)),
                pl.BlockSpec((1, tn), lambda n, j, i: (0, j)),
            ],
            out_specs=pl.BlockSpec((1, toh, OW, tn), lambda n, j, i: (n, i, 0, j)),
        ),
        compiler_params=pltpu.CompilerParams(
            dimension_semantics=("parallel", "parallel", "parallel"),
            vmem_limit_bytes=vmem_limit),
    )(x_eff, w_r, scale2d, bias2d)

    out = out[:, :OH, :, :Cout]               # drop OH / Cout padding (NHWC)
    if out_layout == "NHWC":
        return out                            # chain bf16 NHWC into the next conv
    return jnp.transpose(out, (0, 3, 1, 2))   # NCHW (PyTorch forward semantics)


def _reference(x_nchw, weight_oihw, gamma, beta, running_mean, running_var,
               *, stride=1, padding=0, dilation=1, eps=1e-5):
    sh, sw = _pair(stride)
    ph, pw = _pair(padding)
    dh, dw = _pair(dilation)
    y = lax.conv_general_dilated(
        x_nchw.astype(jnp.float32), weight_oihw.astype(jnp.float32),
        window_strides=(sh, sw),
        padding=((ph, ph), (pw, pw)),
        rhs_dilation=(dh, dw),
        dimension_numbers=("NCHW", "OIHW", "NCHW"),
        precision=lax.Precision.HIGHEST)
    inv = 1.0 / jnp.sqrt(running_var + eps)
    return (y - running_mean[None, :, None, None]) * (gamma * inv)[None, :, None, None] \
        + beta[None, :, None, None]


if __name__ == "__main__":
    key = jax.random.PRNGKey(0)
    k_x, k_w, k_g, k_b, k_m, k_v = jax.random.split(key, 6)

    # BasicConv2d(in_planes=4, out_planes=8, kernel_size=3, stride=1, padding=1)
    N, Cin, H, W = 2, 4, 16, 16
    Cout, KH, KW = 8, 3, 3
    stride, padding, dilation = 1, 1, 1

    x = jax.random.normal(k_x, (N, Cin, H, W), jnp.float32)
    weight = jax.random.normal(k_w, (Cout, Cin, KH, KW), jnp.float32) * 0.1
    gamma = 1.0 + 0.1 * jax.random.normal(k_g, (Cout,), jnp.float32)
    beta = 0.1 * jax.random.normal(k_b, (Cout,), jnp.float32)
    running_mean = 0.1 * jax.random.normal(k_m, (Cout,), jnp.float32)
    running_var = 1.0 + 0.1 * jax.random.uniform(k_v, (Cout,), jnp.float32)

    fn = jax.jit(functools.partial(basic_conv2d, stride=stride, padding=padding,
                                   dilation=dilation))
    out = jax.block_until_ready(fn(x, weight, gamma, beta,
                                   running_mean, running_var))

    # Reference with bf16-rounded operands (kernel feeds the MXU bf16, f32 accum,
    # bf16 store).
    xr = x.astype(jnp.bfloat16).astype(jnp.float32)
    wr = weight.astype(jnp.bfloat16).astype(jnp.float32)
    ref = _reference(xr, wr, gamma, beta, running_mean, running_var,
                     stride=stride, padding=padding, dilation=dilation)

    assert out.shape == (N, Cout, H, W), out.shape
    out_f32 = out.astype(jnp.float32)
    max_err = float(jnp.max(jnp.abs(out_f32 - ref)))
    assert jnp.allclose(out_f32, ref, atol=2e-2, rtol=2e-2), max_err

    print("KERNEL_OK")
</pallas_src>

<mosaic_0001>
module attributes {stable_mosaic.version = 11 : i64} {
  func.func @_conv_bn_kernel(%arg0: i32, %arg1: i32, %arg2: i32, %arg3: memref<1x18x16x12xbf16, #tpu.memory_space<vmem>>, %arg4: memref<3x12x128xbf16, #tpu.memory_space<vmem>>, %arg5: memref<1x128xf32, #tpu.memory_space<vmem>>, %arg6: memref<1x128xf32, #tpu.memory_space<vmem>>, %arg7: memref<1x16x16x128xbf16, #tpu.memory_space<vmem>>) attributes {dimension_semantics = [#tpu.dimension_semantics<parallel>, #tpu.dimension_semantics<parallel>, #tpu.dimension_semantics<parallel>], iteration_bounds = array<i64: 2, 1, 1>, scalar_prefetch = 0 : i64, scratch_operands = 0 : i64, tpu.core_type = #tpu.core_type<tc>, window_params = [{transform_indices = @transform_0, window_bounds = array<i64: 1, 18, 16, 12>}, {transform_indices = @transform_1, window_bounds = array<i64: 3, 12, 128>}, {transform_indices = @transform_2, window_bounds = array<i64: 1, 128>}, {transform_indices = @transform_3, window_bounds = array<i64: 1, 128>}, {transform_indices = @transform_4, window_bounds = array<i64: 1, 16, 16, 128>}]} {
    %c16_i32 = arith.constant 16 : i32
    %0 = arith.muli %arg2, %c16_i32 : i32
    %1 = tpu.assume_multiple %0, 8 : i32
    %c0_i32 = arith.constant 0 : i32
    %2 = arith.addi %1, %c0_i32 : i32
    %c0 = arith.constant 0 : index
    %3 = arith.index_cast %2 : i32 to index
    %c0_0 = arith.constant 0 : index
    %c0_1 = arith.constant 0 : index
    %4 = vector.load %arg3[%c0, %3, %c0_0, %c0_1] : memref<1x18x16x12xbf16, #tpu.memory_space<vmem>>, vector<1x16x16x12xbf16>
    %5 = vector.shape_cast %4 : vector<1x16x16x12xbf16> to vector<256x12xbf16>
    %c0_2 = arith.constant 0 : index
    %c0_3 = arith.constant 0 : index
    %c0_4 = arith.constant 0 : index
    %6 = vector.load %arg4[%c0_2, %c0_3, %c0_4] : memref<3x12x128xbf16, #tpu.memory_space<vmem>>, vector<1x12x128xbf16>
    %7 = vector.shape_cast %6 : vector<1x12x128xbf16> to vector<12x128xbf16>
    %cst = arith.constant dense<0.000000e+00> : vector<256x128xf32>
    %8 = tpu.matmul %5, %7, %cst {dimension_numbers = #tpu.dot_dimension_numbers<[1], [0], [0], [1], [0, 0, 1, 1], [], []>} : vector<256x12xbf16>, vector<12x128xbf16>, vector<256x128xf32> -> vector<256x128xf32>
    %c1_i32 = arith.constant 1 : i32
    %9 = arith.addi %1, %c1_i32 : i32
    %c0_5 = arith.constant 0 : index
    %10 = arith.index_cast %9 : i32 to index
    %c0_6 = arith.constant 0 : index
    %c0_7 = arith.constant 0 : index
    %11 = vector.load %arg3[%c0_5, %10, %c0_6, %c0_7] : memref<1x18x16x12xbf16, #tpu.memory_space<vmem>>, vector<1x16x16x12xbf16>
    %12 = vector.shape_cast %11 : vector<1x16x16x12xbf16> to vector<256x12xbf16>
    %c1 = arith.constant 1 : index
    %c0_8 = arith.constant 0 : index
    %c0_9 = arith.constant 0 : index
    %13 = vector.load %arg4[%c1, %c0_8, %c0_9] : memref<3x12x128xbf16, #tpu.memory_space<vmem>>, vector<1x12x128xbf16>
    %14 = vector.shape_cast %13 : vector<1x12x128xbf16> to vector<12x128xbf16>
    %cst_10 = arith.constant dense<0.000000e+00> : vector<256x128xf32>
    %15 = tpu.matmul %12, %14, %cst_10 {dimension_numbers = #tpu.dot_dimension_numbers<[1], [0], [0], [1], [0, 0, 1, 1], [], []>} : vector<256x12xbf16>, vector<12x128xbf16>, vector<256x128xf32> -> vector<256x128xf32>
    %16 = arith.addf %8, %15 : vector<256x128xf32>
    %c2_i32 = arith.constant 2 : i32
    %17 = arith.addi %1, %c2_i32 : i32
    %c0_11 = arith.constant 0 : index
    %18 = arith.index_cast %17 : i32 to index
    %c0_12 = arith.constant 0 : index
    %c0_13 = arith.constant 0 : index
    %19 = vector.load %arg3[%c0_11, %18, %c0_12, %c0_13] : memref<1x18x16x12xbf16, #tpu.memory_space<vmem>>, vector<1x16x16x12xbf16>
    %20 = vector.shape_cast %19 : vector<1x16x16x12xbf16> to vector<256x12xbf16>
    %c2 = arith.constant 2 : index
    %c0_14 = arith.constant 0 : index
    %c0_15 = arith.constant 0 : index
    %21 = vector.load %arg4[%c2, %c0_14, %c0_15] : memref<3x12x128xbf16, #tpu.memory_space<vmem>>, vector<1x12x128xbf16>
    %22 = vector.shape_cast %21 : vector<1x12x128xbf16> to vector<12x128xbf16>
    %cst_16 = arith.constant dense<0.000000e+00> : vector<256x128xf32>
    %23 = tpu.matmul %20, %22, %cst_16 {dimension_numbers = #tpu.dot_dimension_numbers<[1], [0], [0], [1], [0, 0, 1, 1], [], []>} : vector<256x12xbf16>, vector<12x128xbf16>, vector<256x128xf32> -> vector<256x128xf32>
    %24 = arith.addf %16, %23 : vector<256x128xf32>
    %c0_17 = arith.constant 0 : index
    %c0_18 = arith.constant 0 : index
    %25 = vector.load %arg5[%c0_17, %c0_18] : memref<1x128xf32, #tpu.memory_space<vmem>>, vector<1x128xf32>
    %26 = vector.broadcast %25 : vector<1x128xf32> to vector<256x128xf32>
    %27 = arith.mulf %24, %26 : vector<256x128xf32>
    %c0_19 = arith.constant 0 : index
    %c0_20 = arith.constant 0 : index
    %28 = vector.load %arg6[%c0_19, %c0_20] : memref<1x128xf32, #tpu.memory_space<vmem>>, vector<1x128xf32>
    %29 = vector.broadcast %28 : vector<1x128xf32> to vector<256x128xf32>
    %30 = arith.addf %27, %29 : vector<256x128xf32>
    %31 = vector.shape_cast %30 : vector<256x128xf32> to vector<1x16x16x128xf32>
    %32 = arith.truncf %31 : vector<1x16x16x128xf32> to vector<1x16x16x128xbf16>
    %c0_21 = arith.constant 0 : index
    %c0_22 = arith.constant 0 : index
    %c0_23 = arith.constant 0 : index
    %c0_24 = arith.constant 0 : index
    %33 = vector.load %arg7[%c0_21, %c0_22, %c0_23, %c0_24] : memref<1x16x16x128xbf16, #tpu.memory_space<vmem>>, vector<1x16x16x128xbf16>
    tpu.vector_store %arg7[%c0_21, %c0_22, %c0_23, %c0_24], %32 {strides = array<i32>} : memref<1x16x16x128xbf16, #tpu.memory_space<vmem>>, vector<1x16x16x128xbf16>,
    return
  }
  func.func @transform_0(%arg0: i32, %arg1: i32, %arg2: i32) -> (i32, i32, i32, i32) {
    %c0_i32 = arith.constant 0 : i32
    %c0_i32_0 = arith.constant 0 : i32
    %c0_i32_1 = arith.constant 0 : i32
    %c0_i32_2 = arith.constant 0 : i32
    return %arg0, %c0_i32, %c0_i32_0, %c0_i32_1 : i32, i32, i32, i32
  }
  func.func @transform_1(%arg0: i32, %arg1: i32, %arg2: i32) -> (i32, i32, i32) {
    %c0_i32 = arith.constant 0 : i32
    %c0_i32_0 = arith.constant 0 : i32
    %c0_i32_1 = arith.constant 0 : i32
    return %c0_i32, %c0_i32_0, %arg1 : i32, i32, i32
  }
  func.func @transform_2(%arg0: i32, %arg1: i32, %arg2: i32) -> (i32, i32) {
    %c0_i32 = arith.constant 0 : i32
    %c0_i32_0 = arith.constant 0 : i32
    return %c0_i32, %arg1 : i32, i32
  }
  func.func @transform_3(%arg0: i32, %arg1: i32, %arg2: i32) -> (i32, i32) {
    %c0_i32 = arith.constant 0 : i32
    %c0_i32_0 = arith.constant 0 : i32
    return %c0_i32, %arg1 : i32, i32
  }
  func.func @transform_4(%arg0: i32, %arg1: i32, %arg2: i32) -> (i32, i32, i32, i32) {
    %c0_i32 = arith.constant 0 : i32
    %c0_i32_0 = arith.constant 0 : i32
    return %arg0, %arg2, %c0_i32, %arg1 : i32, i32, i32, i32
  }
}

</mosaic_0001>

<bundles_post_ra>
// kernel: basic_conv2d.1
= control target key start
LH: loop header
LB: loop body
LE: loop exit
PB: predicated region body
PF: predicated region fallthrough
CT: control target
= control target key end

     0   :  { %s2338_s15 = smov 0   ;;  %s2340_s16 = smov 0   ;;  %s2653_s0 = inlined_call_operand.vmem [shape: bf16[2,18,16,12], index: 0, kind: input, shape index: {}]   ;;  %s2654_s1 = inlined_call_operand.vmem [shape: bf16[3,12,128], index: 1, kind: input, shape index: {}]   ;;  %s2655_s2 = inlined_call_operand.vmem [shape: f32[1,128], index: 2, kind: input, shape index: {}]   ;;  %s2656_s3 = inlined_call_operand.vmem [shape: f32[1,128], index: 3, kind: input, shape index: {}]   ;;  %s2657_s4 = inlined_call_operand.vmem [shape: bf16[2,16,16,128], index: 4, kind: output, shape index: {}]  }
   0x1   :  { %s2342_s17 = smov 0  }
   0x2 LB: > { %s33_s18 = sadd.s32 1, %s2307_s16  ;;  %p1719_p0 = scmp.ge.s32.totalorder %s2311_s17, 1  ;;  %s2311_s17 = sphi %s2342_s17, %s14_s17   ;;  %s2307_s16 = sphi %s2340_s16, %s2659_s16   ;;  %s2303_s15 = sphi %s2338_s15, %s2658_s15  }
   0x3   : > { %p35_p1 = scmp.ge.s32.totalorder %s33_s18, 2  ;;  %p210_p2 = scmp.lt.s32.totalorder %s2311_s17, 3 }
   0x5   : > { %s2661_s18 = smov (%p35_p1, %s33_s18), 0  ;;  %p211_p3 = pnand %p1719_p0, %p210_p2 }
   0x6   : > { %p254_p4 = scmp.lt.s32.totalorder (!%p211_p3), %s2303_s15, 1 }
   0x7   : > { %214 = sbr.rel (%p211_p3) target bundleno = 317 (0x13d), region = 36 }
   0xc   : > { %v2238_v0 = vld [vmem:[%s2654_s1 + $0x8] sm:$0x3f]   ;;  %vm495_vm0 = vcmask 1045504   ;;  %v2241_v2 = vld [vmem:[%s2654_s1] sm:$0x3f]   ;;  %s2663_s15 = smov (!%p254_p4, %s2303_s15), 1 }
   0xd   : > { %2210 = vmatprep.subr.msk.bf16.mxu1 %vm495_vm0, %v2238_v0  ;;  %2209 = vmatprep.subr.msk.bf16.mxu0 %vm495_vm0, %v2238_v0  ;;  %v497_v1 = vsel %vm495_vm0, %v2238_v0, 0  ;;  %v2244_v3 = vld [vmem:[%s2654_s1 + $0x10] sm:$0x3f]   ;;  %s2213_s25 = smul.u32 144, %s2663_s15  ;;  %vm446_vm1 = vcmask 97280   ;;  %v794_v9 = vsel %vm495_vm0, %v2241_v2, 0 }
   0xe   : > { %2208 = vmatpush3.bf16.msra.mxu1 %v497_v1  ;;  %2106 = vmatpush3.bf16.msra.mxu0 %v497_v1  ;;  %v1130_v7 = vsel %vm495_vm0, %v2244_v3, 0  ;;  %s1926_s7 = sshll.u32 %s2663_s15, 7 }
   0xf   : > { %2211 = vmatprep.subr.msk.bf16.mxu1 %vm495_vm0, %v2241_v2  ;;  %2212 = vmatprep.subr.msk.bf16.mxu0 %vm495_vm0, %v2244_v3  ;;  %s2376_s28 = scalar_lea.vmem %s2653_s0, %s2213_s25  ;;  %s2544_s10 = scalar_lea.vmem %s2657_s4, %s1926_s7 }
  0x10   : > { %v2239_v4 = vld [vmem:[%s2376_s28 + $0x8] sm:$0xff]   ;;  %v2242_v6 = vld [vmem:[%s2376_s28 + $0x10] sm:$0xff]   ;;  %v2245_v10 = vld [vmem:[%s2376_s28 + $0x18] sm:$0xff]  }
  0x11   : > { %v2240_v5 = vld [vmem:[%s2376_s28 + $0x48] sm:$0xff]   ;;  %2107 = vmatprep.mubr.msk.bf16.mxu0 %vm446_vm1, %v2239_v4  ;;  %v2243_v8 = vld [vmem:[%s2376_s28 + $0x50] sm:$0xff]   ;;  %v2246_v11 = vld [vmem:[%s2376_s28 + $0x58] sm:$0xff]  }
  0x12   : > { %2123 = vmatprep.mubr.msk.bf16.mxu1 %vm446_vm1, %v2240_v5  ;;  %2108 = vmatmul.mubr.msk.bf16.vlgmr.msra.gmra.mxu0 %vm446_vm1, %v2242_v6  ;;  %v2247_v12 = vld [vmem:[%s2376_s28 + $0x20] sm:$0xff]   ;;  %v2249_v14 = vld [vmem:[%s2376_s28 + $0x28] sm:$0xff]   ;;  %v2251_v16 = vld [vmem:[%s2376_s28 + $0x30] sm:$0xff]  }
  0x13   : > { %2124 = vmatmul.mubr.msk.bf16.vlgmr.msra.gmra.mxu1 %vm446_vm1, %v2243_v8  ;;  %2174 = vmatpush3.bf16.msra.mxu0 %v1130_v7  ;;  %v2248_v13 = vld [vmem:[%s2376_s28 + $0x60] sm:$0xff]   ;;  %v2250_v15 = vld [vmem:[%s2376_s28 + $0x68] sm:$0xff]   ;;  %v2252_v17 = vld [vmem:[%s2376_s28 + $0x70] sm:$0xff]  }
  0x14   : > { %2140 = vmatpush3.bf16.msra.mxu1 %v794_v9  ;;  %2111 = vmatprep.mubr.msk.bf16.mxu0 %vm446_vm1, %v2245_v10  ;;  %v2253_v18 = vld [vmem:[%s2376_s28 + $0x38] sm:$0xff]   ;;  %v2255_v20 = vld [vmem:[%s2376_s28 + $0x40] sm:$0xff]   ;;  %v2258_v22 = vld [vmem:[%s2376_s28 + $0x10] sm:$0xff]  }
  0x15   : > { %2127 = vmatprep.mubr.msk.bf16.mxu1 %vm446_vm1, %v2246_v11  ;;  %v2254_v19 = vld [vmem:[%s2376_s28 + $0x78] sm:$0xff]   ;;  %v2256_v21 = vld [vmem:[%s2376_s28 + $0x80] sm:$0xff]   ;;  %v2259_v24 = vld [vmem:[%s2376_s28 + $0x8] sm:$0xff]  }
  0x16   : > { %v2257_v23 = vld [vmem:[%s2376_s28] sm:$0xff]   ;;  %v2260_v25 = vld [vmem:[%s2376_s28 + $0x18] sm:$0xff]   ;;  %v2261_v27 = vld [vmem:[%s2376_s28 + $0x10] sm:$0xff]  }
  0x17   : > { %v2262_v26 = vld [vmem:[%s2376_s28 + $0x20] sm:$0xff]   ;;  %v2263_v28 = vld [vmem:[%s2376_s28 + $0x18] sm:$0xff]   ;;  %v2264_v29 = vld [vmem:[%s2376_s28 + $0x28] sm:$0xff]  }
  0x18   : > { %v2266_v30 = vld [vmem:[%s2376_s28 + $0x30] sm:$0xff]   ;;  %v2265_v31 = vld [vmem:[%s2376_s28 + $0x20] sm:$0xff]   ;;  %v2268_v32 = vld [vmem:[%s2376_s28 + $0x38] sm:$0xff]  }
  0x19   : > { %v2267_v33 = vld [vmem:[%s2376_s28 + $0x28] sm:$0xff]   ;;  %v2270_v34 = vld [vmem:[%s2376_s28 + $0x40] sm:$0xff]   ;;  %v2269_v35 = vld [vmem:[%s2376_s28 + $0x30] sm:$0xff]  }
  0x1a   : > { %2112 = vmatmul.mubr.msk.bf16.gmra.mxu0 %vm446_vm1, %v2247_v12  ;;  %v2272_v36 = vld [vmem:[%s2376_s28 + $0x48] sm:$0xff]   ;;  %v2271_v37 = vld [vmem:[%s2376_s28 + $0x38] sm:$0xff]   ;;  %v2274_v38 = vld [vmem:[%s2376_s28 + $0x50] sm:$0xff]  }
  0x1b   : > { %2128 = vmatmul.mubr.msk.bf16.gmra.mxu1 %vm446_vm1, %v2248_v13  ;;  %2115 = vmatprep.mubr.msk.bf16.mxu0 %vm446_vm1, %v2249_v14  ;;  %v2273_v39 = vld [vmem:[%s2376_s28 + $0x40] sm:$0xff]   ;;  %v2276_v40 = vld [vmem:[%s2376_s28 + $0x58] sm:$0xff]   ;;  %v2275_v41 = vld [vmem:[%s2376_s28 + $0x48] sm:$0xff]  }
  0x1c   : > { %2131 = vmatprep.mubr.msk.bf16.mxu1 %vm446_vm1, %v2250_v15  ;;  %v2278_v42 = vld [vmem:[%s2376_s28 + $0x60] sm:$0xff]   ;;  %v2277_v43 = vld [vmem:[%s2376_s28 + $0x50] sm:$0xff]   ;;  %v2280_v44 = vld [vmem:[%s2376_s28 + $0x68] sm:$0xff]  }
  0x1d   : > { %v2279_v45 = vld [vmem:[%s2376_s28 + $0x58] sm:$0xff]   ;;  %v2282_v46 = vld [vmem:[%s2376_s28 + $0x70] sm:$0xff]   ;;  %v2281_v47 = vld [vmem:[%s2376_s28 + $0x60] sm:$0xff]  }
  0x1e   : > { %v2284_v48 = vld [vmem:[%s2376_s28 + $0x78] sm:$0xff]   ;;  %v2283_v49 = vld [vmem:[%s2376_s28 + $0x68] sm:$0xff]   ;;  %v2286_v50 = vld [vmem:[%s2376_s28 + $0x80] sm:$0xff]  }
  0x1f   : > { %v2285_v51 = vld [vmem:[%s2376_s28 + $0x70] sm:$0xff]   ;;  %v2288_v52 = vld [vmem:[%s2376_s28 + $0x88] sm:$0xff]   ;;  %v2287_v53 = vld [vmem:[%s2376_s28 + $0x78] sm:$0xff]  }
  0x22   : > { %2116 = vmatmul.mubr.msk.bf16.gmra.mxu0 %vm446_vm1, %v2251_v16 }
  0x23   : > { %2132 = vmatmul.mubr.msk.bf16.gmra.mxu1 %vm446_vm1, %v2252_v17  ;;  %2119 = vmatprep.mubr.msk.bf16.mxu0 %vm446_vm1, %v2253_v18 }
  0x24   : > { %2135 = vmatprep.mubr.msk.bf16.mxu1 %vm446_vm1, %v2254_v19 }
  0x2a   : > { %2120 = vmatmul.mubr.msk.bf16.gmra.mxu0 %vm446_vm1, %v2255_v20 }
  0x2b   : > { %2136 = vmatmul.mubr.msk.bf16.gmra.mxu1 %vm446_vm1, %v2256_v21  ;;  %2175 = vmatprep.mubr.msk.bf16.mxu0 %vm446_vm1, %v2258_v22 }
  0x2c   : > { %2141 = vmatprep.mubr.msk.bf16.mxu1 %vm446_vm1, %v2257_v23 }
  0x32   : > { %2176 = vmatmul.mubr.msk.bf16.vlgmr.msra.gmra.mxu0 %vm446_vm1, %v2260_v25 }
  0x33   : > { %2142 = vmatmul.mubr.msk.bf16.vlgmr.msra.gmra.mxu1 %vm446_vm1, %v2259_v24  ;;  %2179 = vmatprep.mubr.msk.bf16.mxu0 %vm446_vm1, %v2262_v26 }
  0x34   : > { %2145 = vmatprep.mubr.msk.bf16.mxu1 %vm446_vm1, %v2261_v27 }
  0x3a   : > { %2180 = vmatmul.mubr.msk.bf16.gmra.mxu0 %vm446_vm1, %v2264_v29 }
  0x3b   : > { %2146 = vmatmul.mubr.msk.bf16.gmra.mxu1 %vm446_vm1, %v2263_v28  ;;  %2183 = vmatprep.mubr.msk.bf16.mxu0 %vm446_vm1, %v2266_v30  ;;  %v2527_v30 = vld [vmem:[%s2655_s2] ss:$0 sm:$0xff] }
  0x3c   : > { %2149 = vmatprep.mubr.msk.bf16.mxu1 %vm446_vm1, %v2265_v31 }
  0x42   : > { %2184 = vmatmul.mubr.msk.bf16.gmra.mxu0 %vm446_vm1, %v2268_v32 }
  0x43   : > { %2150 = vmatmul.mubr.msk.bf16.gmra.mxu1 %vm446_vm1, %v2267_v33  ;;  %2187 = vmatprep.mubr.msk.bf16.mxu0 %vm446_vm1, %v2270_v34 }
  0x44   : > { %2153 = vmatprep.mubr.msk.bf16.mxu1 %vm446_vm1, %v2269_v35 }
  0x4a   : > { %2188 = vmatmul.mubr.msk.bf16.gmra.mxu0 %vm446_vm1, %v2272_v36 }
  0x4b   : > { %2154 = vmatmul.mubr.msk.bf16.gmra.mxu1 %vm446_vm1, %v2271_v37  ;;  %2191 = vmatprep.mubr.msk.bf16.mxu0 %vm446_vm1, %v2274_v38 }
  0x4c   : > { %2157 = vmatprep.mubr.msk.bf16.mxu1 %vm446_vm1, %v2273_v39 }
  0x52   : > { %2192 = vmatmul.mubr.msk.bf16.gmra.mxu0 %vm446_vm1, %v2276_v40  ;;  %v2533_v40 = vld [vmem:[%s2656_s3] ss:$0 sm:$0xff] }
  0x53   : > { %2158 = vmatmul.mubr.msk.bf16.gmra.mxu1 %vm446_vm1, %v2275_v41  ;;  %2195 = vmatprep.mubr.msk.bf16.mxu0 %vm446_vm1, %v2278_v42 }
  0x54   : > { %2161 = vmatprep.mubr.msk.bf16.mxu1 %vm446_vm1, %v2277_v43 }
  0x5a   : > { %2196 = vmatmul.mubr.msk.bf16.gmra.mxu0 %vm446_vm1, %v2280_v44 }
  0x5b   : > { %2162 = vmatmul.mubr.msk.bf16.gmra.mxu1 %vm446_vm1, %v2279_v45  ;;  %2199 = vmatprep.mubr.msk.bf16.mxu0 %vm446_vm1, %v2282_v46 }
  0x5c   : > { %2165 = vmatprep.mubr.msk.bf16.mxu1 %vm446_vm1, %v2281_v47 }
  0x62   : > { %2200 = vmatmul.mubr.msk.bf16.gmra.mxu0 %vm446_vm1, %v2284_v48 }
  0x63   : > { %2166 = vmatmul.mubr.msk.bf16.gmra.mxu1 %vm446_vm1, %v2283_v49  ;;  %2203 = vmatprep.mubr.msk.bf16.mxu0 %vm446_vm1, %v2286_v50 }
  0x64   : > { %2169 = vmatprep.mubr.msk.bf16.mxu1 %vm446_vm1, %v2285_v51 }
  0x6a   : > { %2204 = vmatmul.mubr.msk.bf16.gmra.mxu0 %vm446_vm1, %v2288_v52 }
  0x6b   : > { %2170 = vmatmul.mubr.msk.bf16.gmra.mxu1 %vm446_vm1, %v2287_v53 }
  0xd2   : > { %v2109_v54 = vpop.f32.mrf.mxu0 }
  0xd3   : > { %v2476_v55 = vpop.f32.mrf.mxu1 }
  0xd4   : > { %v533_v56 = vpop.f32.mrf.mxu0 }
  0xd5   : > { %v2478_v57 = vpop.f32.mrf.mxu1 }
  0xd6   : > { %v2110_v58 = vpop.f32.mrf.mxu0 }
  0xd7   : > { %v2480_v59 = vpop.f32.mrf.mxu1 }
  0xd8   : > { %v536_v60 = vpop.f32.mrf.mxu0 }
  0xd9   : > { %v2482_v61 = vpop.f32.mrf.mxu1 }
  0xda   : > { %v2113_v62 = vpop.f32.mrf.mxu0 }
  0xdb   : > { %v2484_v63 = vpop.f32.mrf.mxu1 }
  0xdc   : > { %v549_v0 = vpop.f32.mrf.mxu0 }
  0xdd   : > { %v2486_v1 = vpop.f32.mrf.mxu1 }
  0xde   : > { %v2114_v2 = vpop.f32.mrf.mxu0 }
  0xdf   : > { %v2488_v3 = vpop.f32.mrf.mxu1 }
  0xe0   : > { %v552_v4 = vpop.f32.mrf.mxu0 }
  0xe1   : > { %v2490_v5 = vpop.f32.mrf.mxu1 }
  0xe2   : > { %v2492_v6 = vpop.f32.mrf.mxu0 }
  0xe3   : > { %v2494_v7 = vpop.f32.mrf.mxu1 }
  0xe4   : > { %v2496_v8 = vpop.f32.mrf.mxu0 }
  0xe5   : > { %v2498_v9 = vpop.f32.mrf.mxu1 }
  0xe6   : > { %v2500_v10 = vpop.f32.mrf.mxu0 }
  0xe7   : > { %v2502_v11 = vpop.f32.mrf.mxu1 }
  0xe8   : > { %v2504_v12 = vpop.f32.mrf.mxu0 }
  0xe9   : > { %v2506_v13 = vpop.f32.mrf.mxu1 }
  0xea   : > { %v2508_v14 = vpop.f32.mrf.mxu0 }
  0xeb   : > { %v2510_v15 = vpop.f32.mrf.mxu1 }
  0xec   : > { %v2512_v16 = vpop.f32.mrf.mxu0 }
  0xed   : > { %v2514_v17 = vpop.f32.mrf.mxu1 }
  0xee   : > { %v2516_v18 = vpop.f32.mrf.mxu0 }
  0xef   : > { %v2518_v19 = vpop.f32.mrf.mxu1 }
  0xf0   : > { %v2520_v20 = vpop.f32.mrf.mxu0 }
  0xf1   : > { %v2522_v21 = vpop.f32.mrf.mxu1 }
  0xf2   : > { %v2177_v22 = vpop.f32.mrf.mxu0 }
  0xf3   : > { %v2143_v23 = vpop.f32.mrf.mxu1 }
  0xf4   : > { %v839_v24 = vadd.f32 %v2143_v23, %v2109_v54  ;;  %v1166_v25 = vpop.f32.mrf.mxu0 }
  0xf5   : > { %v830_v26 = vpop.f32.mrf.mxu1 }
  0xf6   : > { %v1295_v27 = vadd.f32 %v2177_v22, %v839_v24  ;;  %v831_v28 = vadd.f32 %v830_v26, %v533_v56  ;;  %v2178_v29 = vpop.f32.mrf.mxu0 }
  0xf7   : > { %v2144_v31 = vpop.f32.mrf.mxu1 }
  0xf8   : > { %v1293_v32 = vadd.f32 %v1166_v25, %v831_v28  ;;  %v842_v33 = vadd.f32 %v2144_v31, %v2110_v58  ;;  %v1169_v34 = vpop.f32.mrf.mxu0  ;;  %v1334_v36 = vmul.f32 %v2527_v30, %v1295_v27 }
  0xf9   : > { %v833_v35 = vpop.f32.mrf.mxu1 }
  0xfa   : > { %v1296_v37 = vadd.f32 %v2178_v29, %v842_v33  ;;  %v834_v38 = vadd.f32 %v833_v35, %v536_v60  ;;  %v2181_v39 = vpop.f32.mrf.mxu0  ;;  %v1332_v42 = vmul.f32 %v2527_v30, %v1293_v32  ;;  %v1373_v48 = vadd.f32 %v2533_v40, %v1334_v36 }
  0xfb   : > { %v2147_v41 = vpop.f32.mrf.mxu1 }
  0xfc   : > { %v1335_v43 = vmul.f32 %v2527_v30, %v1296_v37  ;;  %v1294_v44 = vadd.f32 %v1169_v34, %v834_v38  ;;  %v855_v45 = vadd.f32 %v2147_v41, %v2113_v62  ;;  %v1182_v46 = vpop.f32.mrf.mxu0  ;;  %v1371_v56 = vadd.f32 %v2533_v40, %v1332_v42 }
  0xfd   : > { %v846_v47 = vpop.f32.mrf.mxu1 }
  0xfe   : > { %v1374_v49 = vadd.f32 %v2533_v40, %v1335_v43  ;;  %v1333_v50 = vmul.f32 %v2527_v30, %v1294_v44  ;;  %v847_v51 = vadd.f32 %v846_v47, %v549_v0  ;;  %v2182_v52 = vpop.f32.mrf.mxu0  ;;  %v1299_v53 = vadd.f32 %v2181_v39, %v855_v45 }
  0xff   : > { %v2148_v54 = vpop.f32.mrf.mxu1 }
 0x100   : > { %v1967_v58 = vpack.c.bf16 %v1374_v49, %v1373_v48  ;;  %v1372_v60 = vadd.f32 %v2533_v40, %v1333_v50  ;;  %v1297_v62 = vadd.f32 %v1182_v46, %v847_v51  ;;  %v1185_v22 = vpop.f32.mrf.mxu0  ;;  %v858_v23 = vadd.f32 %v2148_v54, %v2114_v2 }
 0x101   : > { %v849_v24 = vpop.f32.mrf.mxu1  ;;  %v1338_v27 = vmul.f32 %v2527_v30, %v1299_v53 }
 0x102   : > { %2039 = vst [vmem:[%s2544_s10 + $0x8] sm:$0xff] %v1967_v58   ;;  %v1962_v0 = vpack.c.bf16 %v1372_v60, %v1371_v56  ;;  %v850_v25 = vadd.f32 %v849_v24, %v552_v4  ;;  %v2185_v26 = vpop.f32.mrf.mxu0  ;;  %v1300_v28 = vadd.f32 %v2182_v52, %v858_v23  ;;  %v1336_v31 = vmul.f32 %v2527_v30, %v1297_v62 }
 0x103   : > { %v2151_v29 = vpop.f32.mrf.mxu1  ;;  %v1377_v39 = vadd.f32 %v2533_v40, %v1338_v27 }
 0x104   : > { %1963 = vst [vmem:[%s2544_s10] sm:$0xff] %v1962_v0   ;;  %v1298_v32 = vadd.f32 %v1185_v22, %v850_v25  ;;  %v871_v33 = vadd.f32 %v2151_v29, %v2492_v6  ;;  %v1198_v34 = vpop.f32.mrf.mxu0  ;;  %v1339_v35 = vmul.f32 %v2527_v30, %v1300_v28  ;;  %v1375_v43 = vadd.f32 %v2533_v40, %v1336_v31 }
 0x105   : > { %v862_v36 = vpop.f32.mrf.mxu1 }
 0x106   : > { %v1337_v2 = vmul.f32 %v2527_v30, %v1298_v32  ;;  %v1303_v37 = vadd.f32 %v2185_v26, %v871_v33  ;;  %v863_v4 = vadd.f32 %v862_v36, %v2496_v8  ;;  %v2186_v38 = vpop.f32.mrf.mxu0  ;;  %v1378_v41 = vadd.f32 %v2533_v40, %v1339_v35 }
 0x107   : > { %v2152_v42 = vpop.f32.mrf.mxu1 }
 0x108   : > { %v1376_v6 = vadd.f32 %v2533_v40, %v1337_v2  ;;  %v874_v44 = vadd.f32 %v2152_v42, %v2500_v10  ;;  %v1201_v45 = vpop.f32.mrf.mxu0  ;;  %v1977_v46 = vpack.c.bf16 %v1378_v41, %v1377_v39  ;;  %v1301_v47 = vadd.f32 %v1198_v34, %v863_v4 }
 0x109   : > { %v865_v48 = vpop.f32.mrf.mxu1  ;;  %v1342_v8 = vmul.f32 %v2527_v30, %v1303_v37 }
 0x10a   : > { %v1972_v49 = vpack.c.bf16 %v1376_v6, %v1375_v43  ;;  %v1304_v50 = vadd.f32 %v2186_v38, %v874_v44  ;;  %v2189_v51 = vpop.f32.mrf.mxu0  ;;  %2041 = vst [vmem:[%s2544_s10 + $0x18] sm:$0xff] %v1977_v46   ;;  %v866_v52 = vadd.f32 %v865_v48, %v2504_v12  ;;  %v1340_v10 = vmul.f32 %v2527_v30, %v1301_v47 }
 0x10b   : > { %v2155_v53 = vpop.f32.mrf.mxu1  ;;  %v1381_v22 = vadd.f32 %v2533_v40, %v1342_v8 }
 0x10c   : > { %2040 = vst [vmem:[%s2544_s10 + $0x10] sm:$0xff] %v1972_v49   ;;  %v1343_v54 = vmul.f32 %v2527_v30, %v1304_v50  ;;  %v887_v56 = vadd.f32 %v2155_v53, %v2508_v14  ;;  %v1214_v58 = vpop.f32.mrf.mxu0  ;;  %v1302_v60 = vadd.f32 %v1201_v45, %v866_v52  ;;  %v1379_v31 = vadd.f32 %v2533_v40, %v1340_v10 }
 0x10d   : > { %v878_v62 = vpop.f32.mrf.mxu1 }
 0x10e   : > { %v1382_v23 = vadd.f32 %v2533_v40, %v1343_v54  ;;  %v1307_v24 = vadd.f32 %v2189_v51, %v887_v56  ;;  %v879_v0 = vadd.f32 %v878_v62, %v2512_v16  ;;  %v2190_v12 = vpop.f32.mrf.mxu0  ;;  %v1341_v25 = vmul.f32 %v2527_v30, %v1302_v60 }
 0x10f   : > { %v2156_v26 = vpop.f32.mrf.mxu1 }
 0x110   : > { %v1987_v27 = vpack.c.bf16 %v1382_v23, %v1381_v22  ;;  %v1305_v28 = vadd.f32 %v1214_v58, %v879_v0  ;;  %v890_v14 = vadd.f32 %v2156_v26, %v2516_v18  ;;  %v1217_v29 = vpop.f32.mrf.mxu0  ;;  %v1380_v32 = vadd.f32 %v2533_v40, %v1341_v25 }
 0x111   : > { %v881_v33 = vpop.f32.mrf.mxu1  ;;  %v1346_v34 = vmul.f32 %v2527_v30, %v1307_v24 }
 0x112   : > { %2043 = vst [vmem:[%s2544_s10 + $0x28] sm:$0xff] %v1987_v27   ;;  %v1308_v35 = vadd.f32 %v2190_v12, %v890_v14  ;;  %v882_v16 = vadd.f32 %v881_v33, %v2520_v20  ;;  %v2193_v36 = vpop.f32.mrf.mxu0  ;;  %v1982_v2 = vpack.c.bf16 %v1380_v32, %v1379_v31  ;;  %v1344_v4 = vmul.f32 %v2527_v30, %v1305_v28 }
 0x113   : > { %v2159_v37 = vpop.f32.mrf.mxu1  ;;  %v1385_v43 = vadd.f32 %v2533_v40, %v1346_v34 }
 0x114   : > { %v1347_v18 = vmul.f32 %v2527_v30, %v1308_v35  ;;  %v1306_v38 = vadd.f32 %v1217_v29, %v882_v16  ;;  %v903_v39 = vadd.f32 %v2159_v37, %v2476_v55  ;;  %v1230_v41 = vpop.f32.mrf.mxu0  ;;  %2042 = vst [vmem:[%s2544_s10 + $0x20] sm:$0xff] %v1982_v2   ;;  %v1383_v48 = vadd.f32 %v2533_v40, %v1344_v4 }
 0x115   : > { %v894_v42 = vpop.f32.mrf.mxu1 }
 0x116   : > { %v1386_v6 = vadd.f32 %v2533_v40, %v1347_v18  ;;  %v1345_v20 = vmul.f32 %v2527_v30, %v1306_v38  ;;  %v895_v44 = vadd.f32 %v894_v42, %v2478_v57  ;;  %v2194_v45 = vpop.f32.mrf.mxu0  ;;  %v1311_v46 = vadd.f32 %v2193_v36, %v903_v39 }
 0x117   : > { %v2160_v47 = vpop.f32.mrf.mxu1 }
 0x118   : > { %v1997_v49 = vpack.c.bf16 %v1386_v6, %v1385_v43  ;;  %v1384_v55 = vadd.f32 %v2533_v40, %v1345_v20  ;;  %v1309_v8 = vadd.f32 %v1230_v41, %v895_v44  ;;  %v1233_v50 = vpop.f32.mrf.mxu0  ;;  %v906_v51 = vadd.f32 %v2160_v47, %v2480_v59 }
 0x119   : > { %v897_v52 = vpop.f32.mrf.mxu1  ;;  %v1350_v57 = vmul.f32 %v2527_v30, %v1311_v46 }
 0x11a   : > { %2045 = vst [vmem:[%s2544_s10 + $0x38] sm:$0xff] %v1997_v49   ;;  %v1992_v53 = vpack.c.bf16 %v1384_v55, %v1383_v48  ;;  %v898_v54 = vadd.f32 %v897_v52, %v2482_v61  ;;  %v2197_v56 = vpop.f32.mrf.mxu0  ;;  %v1312_v58 = vadd.f32 %v2194_v45, %v906_v51  ;;  %v1348_v60 = vmul.f32 %v2527_v30, %v1309_v8 }
 0x11b   : > { %v2163_v10 = vpop.f32.mrf.mxu1  ;;  %v1389_v26 = vadd.f32 %v2533_v40, %v1350_v57 }
 0x11c   : > { %2044 = vst [vmem:[%s2544_s10 + $0x30] sm:$0xff] %v1992_v53   ;;  %v1310_v62 = vadd.f32 %v1233_v50, %v898_v54  ;;  %v919_v22 = vadd.f32 %v2163_v10, %v2484_v63  ;;  %v1246_v23 = vpop.f32.mrf.mxu0  ;;  %v1351_v24 = vmul.f32 %v2527_v30, %v1312_v58  ;;  %v1387_v14 = vadd.f32 %v2533_v40, %v1348_v60 }
 0x11d   : > { %v910_v59 = vpop.f32.mrf.mxu1 }
 0x11e   : > { %v1349_v0 = vmul.f32 %v2527_v30, %v1310_v62  ;;  %v1315_v12 = vadd.f32 %v2197_v56, %v919_v22  ;;  %v911_v61 = vadd.f32 %v910_v59, %v2486_v1  ;;  %v2198_v25 = vpop.f32.mrf.mxu0  ;;  %v1390_v27 = vadd.f32 %v2533_v40, %v1351_v24 }
 0x11f   : > { %v2164_v28 = vpop.f32.mrf.mxu1 }
 0x120   : > { %v1388_v63 = vadd.f32 %v2533_v40, %v1349_v0  ;;  %v922_v29 = vadd.f32 %v2164_v28, %v2488_v3  ;;  %v1249_v31 = vpop.f32.mrf.mxu0  ;;  %v2007_v32 = vpack.c.bf16 %v1390_v27, %v1389_v26  ;;  %v1313_v33 = vadd.f32 %v1246_v23, %v911_v61 }
 0x121   : > { %v913_v34 = vpop.f32.mrf.mxu1  ;;  %v1354_v1 = vmul.f32 %v2527_v30, %v1315_v12 }
 0x122   : > { %v2002_v35 = vpack.c.bf16 %v1388_v63, %v1387_v14  ;;  %v1316_v16 = vadd.f32 %v2198_v25, %v922_v29  ;;  %v2201_v36 = vpop.f32.mrf.mxu0  ;;  %2047 = vst [vmem:[%s2544_s10 + $0x48] sm:$0xff] %v2007_v32   ;;  %v914_v2 = vadd.f32 %v913_v34, %v2490_v5  ;;  %v1352_v3 = vmul.f32 %v2527_v30, %v1313_v33 }
 0x123   : > { %v2167_v37 = vpop.f32.mrf.mxu1  ;;  %v1393_v42 = vadd.f32 %v2533_v40, %v1354_v1 }
 0x124   : > { %2046 = vst [vmem:[%s2544_s10 + $0x40] sm:$0xff] %v2002_v35   ;;  %v1355_v4 = vmul.f32 %v2527_v30, %v1316_v16  ;;  %v935_v18 = vadd.f32 %v2167_v37, %v2494_v7  ;;  %v1262_v38 = vpop.f32.mrf.mxu0  ;;  %v1314_v39 = vadd.f32 %v1249_v31, %v914_v2  ;;  %v1391_v49 = vadd.f32 %v2533_v40, %v1352_v3 }
 0x125   : > { %v926_v41 = vpop.f32.mrf.mxu1 }
 0x126   : > { %v1394_v43 = vadd.f32 %v2533_v40, %v1355_v4  ;;  %v1319_v6 = vadd.f32 %v2201_v36, %v935_v18  ;;  %v927_v20 = vadd.f32 %v926_v41, %v2498_v9  ;;  %v2202_v5 = vpop.f32.mrf.mxu0  ;;  %v1353_v44 = vmul.f32 %v2527_v30, %v1314_v39 }
 0x127   : > { %v2168_v45 = vpop.f32.mrf.mxu1 }
 0x128   : > { %v2017_v46 = vpack.c.bf16 %v1394_v43, %v1393_v42  ;;  %v1317_v47 = vadd.f32 %v1262_v38, %v927_v20  ;;  %v938_v7 = vadd.f32 %v2168_v45, %v2502_v11  ;;  %v1265_v48 = vpop.f32.mrf.mxu0  ;;  %v1392_v55 = vadd.f32 %v2533_v40, %v1353_v44 }
 0x129   : > { %v929_v8 = vpop.f32.mrf.mxu1  ;;  %v1358_v50 = vmul.f32 %v2527_v30, %v1319_v6 }
 0x12a   : > { %2049 = vst [vmem:[%s2544_s10 + $0x58] sm:$0xff] %v2017_v46   ;;  %v1320_v51 = vadd.f32 %v2202_v5, %v938_v7  ;;  %v930_v9 = vadd.f32 %v929_v8, %v2506_v13  ;;  %v2205_v52 = vpop.f32.mrf.mxu0  ;;  %v2012_v53 = vpack.c.bf16 %v1392_v55, %v1391_v49  ;;  %v1356_v56 = vmul.f32 %v2527_v30, %v1317_v47 }
 0x12b   : > { %v2171_v54 = vpop.f32.mrf.mxu1  ;;  %v1397_v62 = vadd.f32 %v2533_v40, %v1358_v50 }
 0x12c   : > { %v1359_v11 = vmul.f32 %v2527_v30, %v1320_v51  ;;  %v1318_v57 = vadd.f32 %v1265_v48, %v930_v9  ;;  %v951_v58 = vadd.f32 %v2171_v54, %v2510_v15  ;;  %v1278_v10 = vpop.f32.mrf.mxu0  ;;  %2048 = vst [vmem:[%s2544_s10 + $0x50] sm:$0xff] %v2012_v53   ;;  %v1395_v12 = vadd.f32 %v2533_v40, %v1356_v56 }
 0x12d   : > { %v942_v60 = vpop.f32.mrf.mxu1 }
 0x12e   : > { %v1398_v22 = vadd.f32 %v2533_v40, %v1359_v11  ;;  %v1357_v13 = vmul.f32 %v2527_v30, %v1318_v57  ;;  %v943_v23 = vadd.f32 %v942_v60, %v2514_v17  ;;  %v1323_v24 = vadd.f32 %v2205_v52, %v951_v58  ;;  %v2206_v0 = vpop.f32.mrf.mxu0 }
 0x12f   : > { %v2172_v59 = vpop.f32.mrf.mxu1 }
 0x130   : > { %v2027_v61 = vpack.c.bf16 %v1398_v22, %v1397_v62  ;;  %v1396_v15 = vadd.f32 %v2533_v40, %v1357_v13  ;;  %v1321_v25 = vadd.f32 %v1278_v10, %v943_v23  ;;  %v954_v26 = vadd.f32 %v2172_v59, %v2518_v19  ;;  %v1281_v29 = vpop.f32.mrf.mxu0 }
 0x131   : > { %v945_v27 = vpop.f32.mrf.mxu1  ;;  %v1362_v17 = vmul.f32 %v2527_v30, %v1323_v24 }
 0x132   : > { %2051 = vst [vmem:[%s2544_s10 + $0x68] sm:$0xff] %v2027_v61   ;;  %v2022_v28 = vpack.c.bf16 %v1396_v15, %v1395_v12  ;;  %v946_v14 = vadd.f32 %v945_v27, %v2522_v21  ;;  %v1324_v63 = vadd.f32 %v2206_v0, %v954_v26  ;;  %v1360_v31 = vmul.f32 %v2527_v30, %v1321_v25 }
 0x133   : > { %v1401_v19 = vadd.f32 %v2533_v40, %v1362_v17 }
 0x134   : > { %2050 = vst [vmem:[%s2544_s10 + $0x60] sm:$0xff] %v2022_v28   ;;  %v1322_v32 = vadd.f32 %v1281_v29, %v946_v14  ;;  %v1363_v33 = vmul.f32 %v2527_v30, %v1324_v63  ;;  %v1399_v1 = vadd.f32 %v2533_v40, %v1360_v31 }
 0x136   : > { %v1361_v34 = vmul.f32 %v2527_v30, %v1322_v32  ;;  %v1402_v35 = vadd.f32 %v2533_v40, %v1363_v33 }
 0x138   : > { %v1400_v21 = vadd.f32 %v2533_v40, %v1361_v34  ;;  %v2037_v16 = vpack.c.bf16 %v1402_v35, %v1401_v19 }
 0x13a   : > { %v2032_v36 = vpack.c.bf16 %v1400_v21, %v1399_v1  ;;  %2053 = vst [vmem:[%s2544_s10 + $0x78] sm:$0xff] %v2037_v16  }
 0x13c   : > { %2052 = vst [vmem:[%s2544_s10 + $0x70] sm:$0xff] %v2032_v36  }
 0x13d PF: > { %s14_s17 = sadd.s32 1, %s2311_s17   ;;  %s2658_s15 = smov %s2307_s16 }
 0x13e   : > { %p11_p5 = scmp.ge.s32.totalorder %s14_s17, 4   ;;  %s2659_s16 = smov %s2661_s18 }
 0x140   :  { %13 = sbr.rel (!%p11_p5) target bundleno = 2 (0x2), region = 80 }

</bundles_post_ra>
